<compile_context>
chip_gen: v7x
topology: tpu7x:2x2x1
jax: 0.10.0
libtpu: 0.0.40
codegen_flags: <defaults>
</compile_context>

<pallas_src>
from math import sqrt

import jax
import jax.numpy as jnp
from jax import lax
from jax.experimental import pallas as pl
from jax.experimental.pallas import tpu as pltpu


def _attn_kernel(xq_ref, k_ref, v_ref, wq_ref, wo_ref, bo_ref,
                 out_ref, attn_ref, acc_ref):
    """One (batch, q-tile, head) grid step.

    xq_ref  : (TQ, C)     bf16  query-row tile of x
    k_ref   : (N,  D)     bf16  precomputed keys for (b, h)
    v_ref   : (N,  D)     bf16  precomputed values for (b, h)
    wq_ref  : (H, C, D)   bf16  full Wq slab (scale folded in), VMEM-resident
    wo_ref  : (H, D, C)   bf16  full Wo slab, VMEM-resident
    bo_ref  : (1,  C)     f32   output-projection bias
    out_ref : (TQ, C)     f32   output tile (accumulated over heads)
    attn_ref: (TQ, N)     attn dtype  attention map for (b, h, q-tile)
    acc_ref : (TQ, C)     f32   VMEM scratch accumulator for the head reduction
    """
    h = pl.program_id(2)
    n_heads = pl.num_programs(2)

    @pl.when(h == 0)
    def _():
        acc_ref[...] = jnp.zeros_like(acc_ref)

    xq = xq_ref[...]                      # (TQ, C) bf16
    k = k_ref[...]                        # (N, D)  bf16
    v = v_ref[...]                        # (N, D)  bf16
    wq = wq_ref[h]                        # (C, D)  bf16, dynamic first-axis read
    wo = wo_ref[h]                        # (D, C)  bf16

    # Scaled query projection for this head (full-C contraction on the MXU).
    q = jnp.dot(xq, wq, preferred_element_type=jnp.float32)            # (TQ, D)

    # Scores: contract the last dims of q and k (no transpose materialized).
    s = lax.dot_general(q.astype(jnp.bfloat16), k,
                        dimension_numbers=(((1,), (1,)), ((), ())),
                        preferred_element_type=jnp.float32)            # (TQ, N)

    # Numerically stable softmax; normalization deferred to the (TQ, D) side.
    m = jnp.max(s, axis=-1, keepdims=True)
    e = jnp.exp(s - m)
    inv = pl.reciprocal(jnp.sum(e, axis=-1, keepdims=True))            # exact

    attn_ref[...] = (e * inv).astype(attn_ref.dtype)                   # (TQ, N)

    o = jnp.dot(e.astype(jnp.bfloat16), v,
                preferred_element_type=jnp.float32) * inv              # (TQ, D)

    # Output projection folded into the head reduction:
    #   concat_h(o_h) @ Wo == sum_h o_h @ Wo[h*D:(h+1)*D, :]
    acc_ref[...] += jnp.dot(o.astype(jnp.bfloat16), wo,
                            preferred_element_type=jnp.float32)        # (TQ, C)

    @pl.when(h == n_heads - 1)
    def _():
        out_ref[...] = (acc_ref[...] + bo_ref[...]).astype(out_ref.dtype)


def attention_layer(x, params, H, W, *, n_heads, q_tile=128,
                    attn_dtype=jnp.bfloat16):
    """JAX wrapper mirroring AttentionLayer.forward(x, H, W) with sr_ratio=1.

    x: (B, N, C) float32.  Returns (out (B, N, C) f32, attn (B, H, N, N)).
    H, W are accepted for API parity; unused when sr_ratio == 1.
    q_tile: sweep 256-512 on v5e/v6e for large N; keep 128 on v7x.
    """
    del H, W
    B, N, C = x.shape
    D = C // n_heads
    tq = min(q_tile, N)
    assert N % tq == 0, "sequence length must be divisible by the query tile"

    wq, wkv, wo, bo = params["wq"], params["wkv"], params["wo"], params["bo"]
    scale = 1.0 / sqrt(D)

    # Per-head weight slabs built once outside the kernel; softmax scale folded
    # into Wq; weights cast to bf16 for the MXU (f32 accumulation in-kernel).
    wq_h = (jnp.transpose(wq.reshape(C, n_heads, D), (1, 0, 2)) * scale
            ).astype(jnp.bfloat16)                                     # (H, C, D)
    wo_h = wo.reshape(n_heads, D, C).astype(jnp.bfloat16)              # (H, D, C)
    bo2d = bo.reshape(1, C).astype(jnp.float32)

    # K/V hoisted out of the q-tile loop: one XLA matmul, per-head layout.
    kv = jnp.dot(x, wkv)                                               # (B, N, 2C)
    k_h = jnp.transpose(kv[..., :C].reshape(B, N, n_heads, D),
                        (0, 2, 1, 3)).astype(jnp.bfloat16)             # (B, H, N, D)
    v_h = jnp.transpose(kv[..., C:].reshape(B, N, n_heads, D),
                        (0, 2, 1, 3)).astype(jnp.bfloat16)             # (B, H, N, D)
    xb = x.astype(jnp.bfloat16)

    # Scoped-VMEM budget: ~3/4 of physical VMEM (96 MiB v5e/v6e, 48 MiB v7x).
    try:
        vmem_limit = min(100 * 1024 * 1024,
                         (3 * pltpu.get_tpu_info().vmem_capacity_bytes) // 4)
    except Exception:
        vmem_limit = 64 * 1024 * 1024

    grid = (B, N // tq, n_heads)

    out, attn = pl.pallas_call(
        _attn_kernel,
        out_shape=(
            jax.ShapeDtypeStruct((B, N, C), jnp.float32),
            jax.ShapeDtypeStruct((B, n_heads, N, N), attn_dtype),
        ),
        grid_spec=pltpu.PrefetchScalarGridSpec(
            num_scalar_prefetch=0,
            grid=grid,
            in_specs=[
                pl.BlockSpec((None, tq, C), lambda b, qi, h: (b, qi, 0)),          # x (query rows)
                pl.BlockSpec((None, None, N, D), lambda b, qi, h: (b, h, 0, 0)),   # K[b, h]
                pl.BlockSpec((None, None, N, D), lambda b, qi, h: (b, h, 0, 0)),   # V[b, h]
                pl.BlockSpec((n_heads, C, D), lambda b, qi, h: (0, 0, 0)),         # Wq slab (resident)
                pl.BlockSpec((n_heads, D, C), lambda b, qi, h: (0, 0, 0)),         # Wo slab (resident)
                pl.BlockSpec((1, C), lambda b, qi, h: (0, 0)),                     # bias
            ],
            out_specs=[
                pl.BlockSpec((None, tq, C), lambda b, qi, h: (b, qi, 0)),          # out (head-accumulated)
                pl.BlockSpec((None, None, tq, N), lambda b, qi, h: (b, h, qi, 0)), # attn maps
            ],
            scratch_shapes=[pltpu.VMEM((tq, C), jnp.float32)],
        ),
        compiler_params=pltpu.CompilerParams(
            dimension_semantics=("parallel", "parallel", "arbitrary"),
            vmem_limit_bytes=vmem_limit,
        ),
    )(xb, k_h, v_h, wq_h, wo_h, bo2d)
    return out, attn


def init_params(key, d_model, n_heads):
    """Deterministic parameter init matching the PyTorch module's shapes.

    query_projection:      Linear(C, C),   no bias
    key_value_projection:  Linear(C, 2C),  no bias
    out_projection:        Linear(C, C),   with bias
    Weights are stored transposed so the math is x @ W.
    """
    del n_heads
    k1, k2, k3, k4 = jax.random.split(key, 4)
    C = d_model
    s = 1.0 / sqrt(C)
    return {
        "wq": jax.random.uniform(k1, (C, C), jnp.float32, -s, s),
        "wkv": jax.random.uniform(k2, (C, 2 * C), jnp.float32, -s, s),
        "wo": jax.random.uniform(k3, (C, C), jnp.float32, -s, s),
        "bo": jax.random.uniform(k4, (C,), jnp.float32, -s, s),
    }


def _reference(x, params, n_heads):
    """Plain-JAX f32 reference of the same forward pass."""
    B, N, C = x.shape
    D = C // n_heads
    q = x @ params["wq"]
    kv = x @ params["wkv"]
    k, v = kv[..., :C], kv[..., C:]
    qh = q.reshape(B, N, n_heads, D)
    kh = k.reshape(B, N, n_heads, D)
    vh = v.reshape(B, N, n_heads, D)
    scores = jnp.einsum("blhe,bshe->bhls", qh, kh) / sqrt(D)
    attn = jax.nn.softmax(scores, axis=-1)
    o = jnp.einsum("bhls,bshd->blhd", attn, vh).reshape(B, N, C)
    return o @ params["wo"] + params["bo"], attn


if __name__ == "__main__":
    B, N, C = 2, 16, 32        # batch, sequence length, d_model
    n_heads = 4
    H, W = 4, 4                # spatial dims implied by N = H * W (unused, sr_ratio=1)

    key = jax.random.PRNGKey(0)
    kx, kp = jax.random.split(key)
    x = jax.random.normal(kx, (B, N, C), jnp.float32)
    params = init_params(kp, C, n_heads)

    out, attn = attention_layer(x, params, H, W, n_heads=n_heads)
    out = jax.block_until_ready(out)
    attn = jax.block_until_ready(attn)

    ref_out, ref_attn = _reference(x, params, n_heads)
    assert out.shape == (B, N, C) and attn.shape == (B, n_heads, N, N)
    # Tolerances account for bf16 MXU inputs and the bf16 attention-map store.
    assert jnp.allclose(out, ref_out, atol=3e-2, rtol=3e-2), \
        float(jnp.max(jnp.abs(out - ref_out)))
    assert jnp.allclose(attn.astype(jnp.float32), ref_attn, atol=2e-2, rtol=2e-2), \
        float(jnp.max(jnp.abs(attn.astype(jnp.float32) - ref_attn)))

    print("KERNEL_OK")
</pallas_src>

<mosaic_0001>
module attributes {stable_mosaic.version = 11 : i64} {
  func.func @_attn_kernel(%arg0: i32, %arg1: i32, %arg2: i32, %arg3: memref<1x16x32xbf16, #tpu.memory_space<vmem>>, %arg4: memref<1x1x16x8xbf16, #tpu.memory_space<vmem>>, %arg5: memref<1x1x16x8xbf16, #tpu.memory_space<vmem>>, %arg6: memref<4x32x8xbf16, #tpu.memory_space<vmem>>, %arg7: memref<4x8x32xbf16, #tpu.memory_space<vmem>>, %arg8: memref<1x32xf32, #tpu.memory_space<vmem>>, %arg9: memref<1x16x32xf32, #tpu.memory_space<vmem>>, %arg10: memref<1x1x16x16xbf16, #tpu.memory_space<vmem>>, %arg11: memref<16x32xf32, #tpu.memory_space<vmem>>) attributes {dimension_semantics = [#tpu.dimension_semantics<parallel>, #tpu.dimension_semantics<parallel>, #tpu.dimension_semantics<arbitrary>], iteration_bounds = array<i64: 2, 1, 4>, scalar_prefetch = 0 : i64, scratch_operands = 1 : i64, tpu.core_type = #tpu.core_type<tc>, window_params = [{transform_indices = @transform_0, window_bounds = array<i64: 1, 16, 32>}, {transform_indices = @transform_1, window_bounds = array<i64: 1, 1, 16, 8>}, {transform_indices = @transform_2, window_bounds = array<i64: 1, 1, 16, 8>}, {pipeline_mode = #tpu.pipeline_mode<synchronous>, transform_indices = @transform_3, window_bounds = array<i64: 4, 32, 8>}, {pipeline_mode = #tpu.pipeline_mode<synchronous>, transform_indices = @transform_4, window_bounds = array<i64: 4, 8, 32>}, {pipeline_mode = #tpu.pipeline_mode<synchronous>, transform_indices = @transform_5, window_bounds = array<i64: 1, 32>}, {transform_indices = @transform_6, window_bounds = array<i64: 1, 16, 32>}, {transform_indices = @transform_7, window_bounds = array<i64: 1, 1, 16, 16>}]} {
    %c0_i32 = arith.constant 0 : i32
    %0 = arith.cmpi eq, %arg2, %c0_i32 : i32
    %1 = arith.extui %0 : i1 to i32
    %c0_i32_0 = arith.constant 0 : i32
    %2 = arith.cmpi ne, %1, %c0_i32_0 : i32
    scf.if %2 {
      %cst_29 = arith.constant 0.000000e+00 : f32
      %44 = vector.broadcast %cst_29 : f32 to vector<16x32xf32>
      %c0_30 = arith.constant 0 : index
      %c0_31 = arith.constant 0 : index
      %45 = vector.load %arg11[%c0_30, %c0_31] : memref<16x32xf32, #tpu.memory_space<vmem>>, vector<16x32xf32>
      tpu.vector_store %arg11[%c0_30, %c0_31], %44 {strides = array<i32>} : memref<16x32xf32, #tpu.memory_space<vmem>>, vector<16x32xf32>,
    } else {
    }
    %c0 = arith.constant 0 : index
    %c0_1 = arith.constant 0 : index
    %c0_2 = arith.constant 0 : index
    %3 = vector.load %arg3[%c0, %c0_1, %c0_2] : memref<1x16x32xbf16, #tpu.memory_space<vmem>>, vector<1x16x32xbf16>
    %4 = vector.shape_cast %3 : vector<1x16x32xbf16> to vector<16x32xbf16>
    %c0_3 = arith.constant 0 : index
    %c0_4 = arith.constant 0 : index
    %c0_5 = arith.constant 0 : index
    %c0_6 = arith.constant 0 : index
    %5 = vector.load %arg4[%c0_3, %c0_4, %c0_5, %c0_6] : memref<1x1x16x8xbf16, #tpu.memory_space<vmem>>, vector<1x1x16x8xbf16>
    %6 = vector.shape_cast %5 : vector<1x1x16x8xbf16> to vector<16x8xbf16>
    %c0_7 = arith.constant 0 : index
    %c0_8 = arith.constant 0 : index
    %c0_9 = arith.constant 0 : index
    %c0_10 = arith.constant 0 : index
    %7 = vector.load %arg5[%c0_7, %c0_8, %c0_9, %c0_10] : memref<1x1x16x8xbf16, #tpu.memory_space<vmem>>, vector<1x1x16x8xbf16>
    %8 = vector.shape_cast %7 : vector<1x1x16x8xbf16> to vector<16x8xbf16>
    %9 = arith.index_cast %arg2 : i32 to index
    %c0_11 = arith.constant 0 : index
    %c0_12 = arith.constant 0 : index
    %10 = vector.load %arg6[%9, %c0_11, %c0_12] : memref<4x32x8xbf16, #tpu.memory_space<vmem>>, vector<1x32x8xbf16>
    %11 = vector.shape_cast %10 : vector<1x32x8xbf16> to vector<32x8xbf16>
    %12 = arith.index_cast %arg2 : i32 to index
    %c0_13 = arith.constant 0 : index
    %c0_14 = arith.constant 0 : index
    %13 = vector.load %arg7[%12, %c0_13, %c0_14] : memref<4x8x32xbf16, #tpu.memory_space<vmem>>, vector<1x8x32xbf16>
    %14 = vector.shape_cast %13 : vector<1x8x32xbf16> to vector<8x32xbf16>
    %cst = arith.constant dense<0.000000e+00> : vector<16x8xf32>
    %15 = tpu.matmul %4, %11, %cst {dimension_numbers = #tpu.dot_dimension_numbers<[1], [0], [0], [1], [0, 0, 1, 1], [], []>} : vector<16x32xbf16>, vector<32x8xbf16>, vector<16x8xf32> -> vector<16x8xf32>
    %16 = arith.truncf %15 : vector<16x8xf32> to vector<16x8xbf16>
    %cst_15 = arith.constant dense<0.000000e+00> : vector<16x16xf32>
    %17 = tpu.matmul %16, %6, %cst_15 {dimension_numbers = #tpu.dot_dimension_numbers<[1], [1], [0], [0], [0, 0, 1, 0], [], []>} : vector<16x8xbf16>, vector<16x8xbf16>, vector<16x16xf32> -> vector<16x16xf32>
    %cst_16 = arith.constant dense<0xFF800000> : vector<16xf32>
    %18 = vector.multi_reduction <maximumf>, %17, %cst_16 [1] : vector<16x16xf32> to vector<16xf32>
    %19 = vector.shape_cast %18 : vector<16xf32> to vector<16x1xf32>
    %20 = vector.broadcast %19 : vector<16x1xf32> to vector<16x16xf32>
    %21 = arith.subf %17, %20 : vector<16x16xf32>
    %22 = math.exp %21 : vector<16x16xf32>
    %cst_17 = arith.constant dense<0.000000e+00> : vector<16xf32>
    %23 = vector.multi_reduction <add>, %22, %cst_17 [1] : vector<16x16xf32> to vector<16xf32>
    %24 = vector.shape_cast %23 : vector<16xf32> to vector<16x1xf32>
    %25 = tpu.reciprocal %24 : vector<16x1xf32> -> vector<16x1xf32>
    %26 = vector.broadcast %25 : vector<16x1xf32> to vector<16x16xf32>
    %27 = arith.mulf %22, %26 : vector<16x16xf32>
    %28 = arith.truncf %27 : vector<16x16xf32> to vector<16x16xbf16>
    %c0_18 = arith.constant 0 : index
    %c0_19 = arith.constant 0 : index
    %c0_20 = arith.constant 0 : index
    %c0_21 = arith.constant 0 : index
    %29 = vector.load %arg10[%c0_18, %c0_19, %c0_20, %c0_21] : memref<1x1x16x16xbf16, #tpu.memory_space<vmem>>, vector<1x1x16x16xbf16>
    %30 = vector.shape_cast %29 : vector<1x1x16x16xbf16> to vector<16x16xbf16>
    %31 = vector.shape_cast %28 : vector<16x16xbf16> to vector<1x1x16x16xbf16>
    tpu.vector_store %arg10[%c0_18, %c0_19, %c0_20, %c0_21], %31 {strides = array<i32>} : memref<1x1x16x16xbf16, #tpu.memory_space<vmem>>, vector<1x1x16x16xbf16>,
    %32 = arith.truncf %22 : vector<16x16xf32> to vector<16x16xbf16>
    %cst_22 = arith.constant dense<0.000000e+00> : vector<16x8xf32>
    %33 = tpu.matmul %32, %8, %cst_22 {dimension_numbers = #tpu.dot_dimension_numbers<[1], [0], [0], [1], [0, 0, 1, 1], [], []>} : vector<16x16xbf16>, vector<16x8xbf16>, vector<16x8xf32> -> vector<16x8xf32>
    %34 = vector.broadcast %25 : vector<16x1xf32> to vector<16x8xf32>
    %35 = arith.mulf %33, %34 : vector<16x8xf32>
    %c0_23 = arith.constant 0 : index
    %c0_24 = arith.constant 0 : index
    %36 = vector.load %arg11[%c0_23, %c0_24] : memref<16x32xf32, #tpu.memory_space<vmem>>, vector<16x32xf32>
    %37 = arith.truncf %35 : vector<16x8xf32> to vector<16x8xbf16>
    %cst_25 = arith.constant dense<0.000000e+00> : vector<16x32xf32>
    %38 = tpu.matmul %37, %14, %cst_25 {dimension_numbers = #tpu.dot_dimension_numbers<[1], [0], [0], [1], [0, 0, 1, 1], [], []>} : vector<16x8xbf16>, vector<8x32xbf16>, vector<16x32xf32> -> vector<16x32xf32>
    %39 = arith.addf %36, %38 : vector<16x32xf32>
    %c0_26 = arith.constant 0 : index
    %c0_27 = arith.constant 0 : index
    %40 = vector.load %arg11[%c0_26, %c0_27] : memref<16x32xf32, #tpu.memory_space<vmem>>, vector<16x32xf32>
    tpu.vector_store %arg11[%c0_26, %c0_27], %39 {strides = array<i32>} : memref<16x32xf32, #tpu.memory_space<vmem>>, vector<16x32xf32>,
    %c3_i32 = arith.constant 3 : i32
    %41 = arith.cmpi eq, %arg2, %c3_i32 : i32
    %42 = arith.extui %41 : i1 to i32
    %c0_i32_28 = arith.constant 0 : i32
    %43 = arith.cmpi ne, %42, %c0_i32_28 : i32
    scf.if %43 {
      %c0_29 = arith.constant 0 : index
      %c0_30 = arith.constant 0 : index
      %44 = vector.load %arg11[%c0_29, %c0_30] : memref<16x32xf32, #tpu.memory_space<vmem>>, vector<16x32xf32>
      %c0_31 = arith.constant 0 : index
      %c0_32 = arith.constant 0 : index
      %45 = vector.load %arg8[%c0_31, %c0_32] : memref<1x32xf32, #tpu.memory_space<vmem>>, vector<1x32xf32>
      %46 = vector.broadcast %45 : vector<1x32xf32> to vector<16x32xf32>
      %47 = arith.addf %44, %46 : vector<16x32xf32>
      %c0_33 = arith.constant 0 : index
      %c0_34 = arith.constant 0 : index
      %c0_35 = arith.constant 0 : index
      %48 = vector.load %arg9[%c0_33, %c0_34, %c0_35] : memref<1x16x32xf32, #tpu.memory_space<vmem>>, vector<1x16x32xf32>
      %49 = vector.shape_cast %48 : vector<1x16x32xf32> to vector<16x32xf32>
      %50 = vector.shape_cast %47 : vector<16x32xf32> to vector<1x16x32xf32>
      tpu.vector_store %arg9[%c0_33, %c0_34, %c0_35], %50 {strides = array<i32>} : memref<1x16x32xf32, #tpu.memory_space<vmem>>, vector<1x16x32xf32>,
    } else {
    }
    return
  }
  func.func @transform_0(%arg0: i32, %arg1: i32, %arg2: i32) -> (i32, i32, i32) {
    %c0_i32 = arith.constant 0 : i32
    %c0_i32_0 = arith.constant 0 : i32
    return %arg0, %arg1, %c0_i32 : i32, i32, i32
  }
  func.func @transform_1(%arg0: i32, %arg1: i32, %arg2: i32) -> (i32, i32, i32, i32) {
    %c0_i32 = arith.constant 0 : i32
    %c0_i32_0 = arith.constant 0 : i32
    %c0_i32_1 = arith.constant 0 : i32
    return %arg0, %arg2, %c0_i32, %c0_i32_0 : i32, i32, i32, i32
  }
  func.func @transform_2(%arg0: i32, %arg1: i32, %arg2: i32) -> (i32, i32, i32, i32) {
    %c0_i32 = arith.constant 0 : i32
    %c0_i32_0 = arith.constant 0 : i32
    %c0_i32_1 = arith.constant 0 : i32
    return %arg0, %arg2, %c0_i32, %c0_i32_0 : i32, i32, i32, i32
  }
  func.func @transform_3(%arg0: i32, %arg1: i32, %arg2: i32) -> (i32, i32, i32) {
    %c0_i32 = arith.constant 0 : i32
    %c0_i32_0 = arith.constant 0 : i32
    %c0_i32_1 = arith.constant 0 : i32
    %c0_i32_2 = arith.constant 0 : i32
    return %c0_i32, %c0_i32_0, %c0_i32_1 : i32, i32, i32
  }
  func.func @transform_4(%arg0: i32, %arg1: i32, %arg2: i32) -> (i32, i32, i32) {
    %c0_i32 = arith.constant 0 : i32
    %c0_i32_0 = arith.constant 0 : i32
    %c0_i32_1 = arith.constant 0 : i32
    %c0_i32_2 = arith.constant 0 : i32
    return %c0_i32, %c0_i32_0, %c0_i32_1 : i32, i32, i32
  }
  func.func @transform_5(%arg0: i32, %arg1: i32, %arg2: i32) -> (i32, i32) {
    %c0_i32 = arith.constant 0 : i32
    %c0_i32_0 = arith.constant 0 : i32
    %c0_i32_1 = arith.constant 0 : i32
    return %c0_i32, %c0_i32_0 : i32, i32
  }
  func.func @transform_6(%arg0: i32, %arg1: i32, %arg2: i32) -> (i32, i32, i32) {
    %c0_i32 = arith.constant 0 : i32
    %c0_i32_0 = arith.constant 0 : i32
    return %arg0, %arg1, %c0_i32 : i32, i32, i32
  }
  func.func @transform_7(%arg0: i32, %arg1: i32, %arg2: i32) -> (i32, i32, i32, i32) {
    %c0_i32 = arith.constant 0 : i32
    %c0_i32_0 = arith.constant 0 : i32
    return %arg0, %arg2, %arg1, %c0_i32 : i32, i32, i32, i32
  }
}

</mosaic_0001>

<bundles_post_ra>
// kernel: tpu_custom_call.1
= control target key start
LH: loop header
LB: loop body
LE: loop exit
PB: predicated region body
PF: predicated region fallthrough
CT: control target
= control target key end

     0   :  { %s2210_s0 = inlined_call_operand.hbm [shape: bf16[2,16,32], index: 0, kind: input, shape index: {}]   ;;  %s2211_s1 = inlined_call_operand.hbm [shape: bf16[2,4,16,8], index: 1, kind: input, shape index: {}]   ;;  %s2212_s2 = inlined_call_operand.hbm [shape: bf16[2,4,16,8], index: 2, kind: input, shape index: {}]   ;;  %s2213_s3 = inlined_call_operand.hbm [shape: bf16[4,32,8], index: 3, kind: input, shape index: {}]   ;;  %s2214_s4 = inlined_call_operand.hbm [shape: bf16[4,8,32], index: 4, kind: input, shape index: {}]   ;;  %s2215_s5 = inlined_call_operand.hbm [shape: f32[1,32], index: 5, kind: input, shape index: {}]   ;;  %s2216_s6 = inlined_call_operand.hbm [shape: f32[2,16,32], index: 6, kind: output, shape index: {0}]   ;;  %s2217_s7 = inlined_call_operand.hbm [shape: bf16[2,4,16,16], index: 7, kind: output, shape index: {1}]  }
   0x1   :  { %2258 = sst [smem:[#allocation38_spill]] %s2210_s0 }
   0x2   :  { %2259 = sst [smem:[#allocation39_spill]] %s2211_s1 }
   0x3   :  { %2260 = sst [smem:[#allocation40_spill]] %s2212_s2 }
   0x4   :  { %2261 = sst [smem:[#allocation41_spill]] %s2213_s3 }
   0x5   :  { %2262 = sst [smem:[#allocation42_spill]] %s2214_s4 }
   0x6   :  { %2263 = sst [smem:[#allocation43_spill]] %s2215_s5 }
   0x7   :  { %2264 = sst [smem:[#allocation44_spill]] %s2216_s6 }
   0x8   :  { %2265 = sst [smem:[#allocation45_spill]] %s2217_s7 }
   0x9   :  { %13 = vsyncpa [#allocation4], 0 }
   0xa   :  { %15 = vsyncpa [#allocation4 + $0x1], 0 }
   0xb   :  { %16 = vsyncpa [#allocation7], 0 }
   0xc   :  { %18 = vsyncpa [#allocation7 + $0x1], 0 }
   0xd   :  { %19 = vsyncpa [#allocation10], 0 }
   0xe   :  { %20 = vsyncpa [#allocation13], 0 }
   0xf   :  { %21 = vsyncpa [#allocation5], 0 }
  0x10   :  { %23 = vsyncpa [#allocation5 + $0x1], 0 }
  0x11   :  { %24 = vsyncpa [#allocation16], 0 }
  0x12   :  { %26 = vsyncpa [#allocation16 + $0x1], 0  ;;  %s1681_s24 = smov 0   ;;  %s1683_s25 = smov 0  }
  0x13   :  { %s1685_s26 = smov 0   ;;  %s1687_s27 = smov 0  }
  0x14   :  { %s1689_s28 = smov 0   ;;  %s1691_s29 = smov 0  }
  0x15   :  { %s1693_s30 = smov 0   ;;  %s1695_s8 = smov 0  }
  0x16   :  { %s1697_s9 = smov 0   ;;  %s1699_s10 = smov 0  }
  0x17   :  { %s1701_s11 = smov 0  }
  0x18 LB: > { %2266 = sst [smem:[#allocation23_spill]] %s1582_s24  ;;  %s1737_s12 = sadd.s32 4294967295, %s1622_s11   ;;  %s1622_s11 = sphi %s1701_s11, %s32_s11   ;;  %s1618_s10 = sphi %s1699_s10, %s2348_s10   ;;  %s1614_s9 = sphi %s1697_s9, %s2340_s9   ;;  %s1610_s8 = sphi %s1695_s8, %s2347_s8   ;;  %s1606_s30 = sphi %s1693_s30, %s2339_s30   ;;  %s1602_s29 = sphi %s1691_s29, %s2346_s29   ;;  %s1598_s28 = sphi %s1689_s28, %s2345_s28   ;;  %s1594_s27 = sphi %s1687_s27, %s2344_s27   ;;  %s1590_s26 = sphi %s1685_s26, %s2343_s26   ;;  %s1586_s25 = sphi %s1683_s25, %s2342_s25   ;;  %s1582_s24 = sphi %s1681_s24, %s2337_s24  }
  0x19   : > { %2267 = sst [smem:[#allocation24_spill]] %s1586_s25  ;;  %s1020_s13 = sadd.s32 4294967294, %s1622_s11  }
  0x1a   : > { %2268 = sst [smem:[#allocation25_spill]] %s1594_s27  ;;  %p73_p0 = scmp.ne.s32.totalorder %s1598_s28, %s1594_s27 }
  0x1b   : > { %2269 = sst [smem:[#allocation26_spill]] %s1606_s30  ;;  %p2222_p1 = scmp.eq.s32.totalorder %s1737_s12, 0 }
  0x1c   : > { %2270 = sst [smem:[#allocation27_spill]] %s1610_s8  ;;  %p101_p2 = scmp.ne.s32.totalorder %s1586_s25, %s1582_s24 }
  0x1d   : > { %2271 = sst [smem:[#allocation28_spill]] %s1614_s9  ;;  %p1747_p3 = por %p2222_p1, %p73_p0 }
  0x1e   : > { %p224_p4 = scmp.eq.s32.totalorder %s1020_s13, 7  ;;  %p1753_p5 = por %p101_p2, %p2222_p1 }
  0x1f   : > { %s2272_s14 = scalar_select %p1747_p3, 1, 0 }
  0x20   : > { %s2274_s15 = scalar_select %p1753_p5, 1, 0 }
  0x21   : > { %2273 = sst [smem:[#allocation29_spill]] %s2272_s14  ;;  %p1021_p6 = scmp.ge.s32.totalorder %s1622_s11, 1 }
  0x22   : > { %2275 = sst [smem:[#allocation30_spill]] %s2274_s15  ;;  %p1758_p7 = por %p224_p4, %p73_p0 }
  0x23   : > { %p1762_p8 = por %p224_p4, %p101_p2  ;;  %p261_p9 = scmp.lt.s32.totalorder %s1622_s11, 9 }
  0x24   : > { %s2276_s16 = scalar_select %p1758_p7, 1, 0 }
  0x25   : > { %s2278_s17 = scalar_select %p1762_p8, 1, 0 }
  0x26   : > { %2277 = sst [smem:[#allocation31_spill]] %s2276_s16  ;;  %p1767_p10 = pnand %p1021_p6, %p261_p9 }
  0x27   : > { %2279 = sst [smem:[#allocation32_spill]] %s2278_s17  ;;  %s1624_s19 = smov [#allocation9]  }
  0x28   : > { %s2280_s18 = scalar_select %p1767_p10, 1, 0 }
  0x29   : > { %s273_s20 = sshll.u32 %s1624_s19, 4  ;;  %p1134_p11 = pneg %p1767_p10  ;;  %s274_s20 = int_to_ptr.vmem [resolvable:$true] %s273_s20 }
  0x2a   : > { %2281 = sst [smem:[#allocation33_spill]] %s2280_s18  ;;  %s2283_s3 = sld [smem:[#allocation41_spill]] }
  0x2b   : > { %p1775_p12 = pnand %p1134_p11, %p2222_p1 }
  0x2d   : > { %s2282_s21 = scalar_select %p1775_p12, 1, 0 }
  0x2e   : > { %p1787_p0 = pneg %p1775_p12 }
  0x30   : > { %s1282_s13 = scalar_lea.hbm %s2283_s3, 1024 }
  0x31   : > { %p1283_p13 = scmp.ne.s32.totalorder %s2283_s3, %s1282_s13  ;;  %p1289_p6 = scmp.lt.u32.totalorder %s1282_s13, %s2283_s3 }
  0x33   : > { %p1285_p2 = pnand %p1787_p0, %p1283_p13 }
  0x35   : > { %p1286_p4 = pneg %p1285_p2 }
  0x37   : > { %p1291_p9 = pnand %p1289_p6, %p1286_p4 }
  0x39   : > { %1294 = shalt.err (!%p1291_p9)
}
  0x3a   : > { %s1295_s22 = scalar_lea.vmem %s274_s20, 1024  ;;  %p1303_p7 = scmp.lt.s32.totalorder %s274_s20, %s274_s20 }
  0x3b   : > { %p1296_p11 = scmp.ne.s32.totalorder %s274_s20, %s1295_s22  ;;  %p1304_p5 = scmp.lt.s32.totalorder %s1295_s22, %s1295_s22 }
  0x3d   : > { %p1298_p1 = pnand %p1296_p11, %p1787_p0  ;;  %p1305_p3 = por %p1304_p5, %p1303_p7 }
  0x3f   : > { %p1299_p8 = pneg %p1298_p1 }
  0x41   : > { %p1306_p10 = pnand %p1305_p3, %p1299_p8 }
  0x43   : > { %1309 = shalt.err (!%p1306_p10)
}
  0x44   : > { %s2227_s24 = smov 64   ;;  %s2229_s27 = smov 4  }
  0x45   : > { %1137 = dma.hbm_to_vmem [thread:$0]  (!%p1775_p12), %s2283_s3, 1024, %s274_s20, [#allocation10], %s2227_s24, %s2227_s24, %s2229_s27  }
  0x46   : > { %p2247_p1 = scmp.eq.s32.totalorder %s1737_s12, 7  ;;  %s44_s23 = sadd.s32 1, %s1614_s9 }
  0x47   : > { %p45_p3 = scmp.ge.s32.totalorder %s44_s23, 4  ;;  %s51_s13 = sadd.s32 1, %s1618_s10 }
  0x48   : > { %p2248_p5 = scmp.eq.s32.totalorder %s1622_s11, 0  ;;  %p95_p7 = scmp.ne.s32.totalorder %s1590_s26, %s1586_s25 }
  0x49   : > { %s2350_s23 = smov (%p45_p3, %s44_s23), 0  ;;  %s2352_s13 = smov (!%p45_p3, %s51_s13), %s1618_s10 }
  0x4a   : > { %2285 = sst [smem:[#allocation34_spill]] %s2350_s23  ;;  %s84_s22 = ssub.s32 %s1614_s9, %s2350_s23 }
  0x4b   : > { %s88_s7 = sadd.s32 1, %s1590_s26  ;;  %p53_p8 = scmp.ge.s32.totalorder %s2352_s13, 2 }
  0x4c   : > { %p1820_p10 = por %p2247_p1, %p95_p7  ;;  %p1826_p13 = por %p95_p7, %p2248_p5 }
  0x4d   : > { %s334_s17 = sand.u32 1, %s1622_s11   ;;  %s2354_s13 = smov (%p53_p8, %s2352_s13), 0 }
  0x4e   : > { %s2286_s20 = scalar_select %p1820_p10, 1, 0 }
  0x4f   : > { %2289 = sst [smem:[#allocation36_spill]] %s2354_s13  ;;  %p2246_p2 = scmp.lt.s32.totalorder %s1622_s11, 8 }
  0x50   : > { %2287 = sst [smem:[#allocation35_spill]] %s2286_s20  ;;  %s336_s24 = sand.u32 1, %s1590_s26  }
  0x51   : > { %s1837_s27 = ssub.s32 %s1618_s10, %s2354_s13  ;;  %s1839_s3 = sshll.u32 %s336_s24, 3 }
  0x52   : > { %s85_s23 = sor.u32 %s84_s22, %s1837_s27  ;;  %s1030_s20 = sshll.u32 %s1614_s9, 1 }
  0x53   : > { %p86_p4 = scmp.eq.s32.totalorder %s85_s23, 0  ;;  %s1031_s6 = sshll.u32 %s1618_s10, 3 }
  0x54   : > { %s344_s30 = sadd.s32 %s1031_s6, %s1030_s20  ;;  %s338_s15 = scalar_lea.vmem [#allocation6], %s1839_s3 }
  0x55   : > { %s1845_s8 = scalar_select %p86_p4, %s1590_s26, %s88_s7  }
  0x56   : > { %s347_s25 = sshll.u32 %s338_s15, 4  ;;  %s1032_s14 = sshll.u32 %s344_s30, 6  ;;  %s1848_s25 = int_to_ptr.vmem [resolvable:$true] %s347_s25 }
  0x57   : > { %2290 = sst [smem:[#allocation37_spill]] %s1845_s8  ;;  %s2291_s1 = sld [smem:[#allocation39_spill]] }
  0x58   : > { %p1859_p6 = pnand %p2246_p2, %p1826_p13  ;;  %s2293_s2 = sld [smem:[#allocation40_spill]] }
  0x59   : > { %s1869_s18 = scalar_lea.sflag [#allocation7], %s334_s17 }
  0x5a   : > { %s2292_s7 = scalar_select %p1859_p6, 1, 0 }
  0x5b   : > { %p2253_p3 = pneg %p1859_p6 }
  0x5d   : > { %s1853_s0 = scalar_lea.hbm %s2291_s1, %s1032_s14  ;;  %s1315_s22 = scalar_lea.hbm %s2291_s1, 1024 }
  0x5e   : > { %s1867_s15 = scalar_lea.hbm %s2293_s2, %s1032_s14  ;;  %s1310_s24 = scalar_lea.hbm %s1853_s0, 128 }
  0x5f   : > { %p1311_p11 = scmp.ne.s32.totalorder %s1853_s0, %s1310_s24  ;;  %p1316_p13 = scmp.lt.u32.totalorder %s1853_s0, %s2291_s1 }
  0x60   : > { %p1317_p4 = scmp.lt.u32.totalorder %s1315_s22, %s1310_s24  ;;  %p1319_p1 = scmp.lt.u32.totalorder %s1310_s24, %s1853_s0 }
  0x61   : > { %p1313_p7 = pnand %p2253_p3, %p1311_p11 }
  0x62   : > { %p1318_p2 = por %p1317_p4, %p1316_p13 }
  0x63   : > { %p1314_p8 = pneg %p1313_p7 }
  0x64   : > { %p1320_p5 = por %p1319_p1, %p1318_p2 }
  0x66   : > { %p1321_p9 = pnand %p1320_p5, %p1314_p8 }
  0x68   : > { %1324 = shalt.err (!%p1321_p9)
}
  0x69   : > { %s1325_s14 = scalar_lea.vmem %s1848_s25, 128  ;;  %s1627_s17 = smov [#allocation6]  }
  0x6a   : > { %p1326_p11 = scmp.ne.s32.totalorder %s1848_s25, %s1325_s14  ;;  %s1330_s6 = sshll.u32 %s1627_s17, 4  ;;  %s1331_s6 = int_to_ptr.vmem [resolvable:$false] %s1330_s6 }
  0x6b   : > { %s1332_s30 = scalar_lea.vmem %s1331_s6, 256  ;;  %p1333_p12 = scmp.lt.s32.totalorder %s1848_s25, %s1331_s6 }
  0x6c   : > { %p1328_p7 = pnand %p1326_p11, %p2253_p3  ;;  %p1334_p13 = scmp.lt.s32.totalorder %s1332_s30, %s1325_s14 }
  0x6e   : > { %p1329_p10 = pneg %p1328_p7  ;;  %p1335_p4 = por %p1334_p13, %p1333_p12 }
  0x70   : > { %p1336_p1 = pnand %p1335_p4, %p1329_p10 }
  0x72   : > { %1339 = shalt.err (!%p1336_p1)
}
  0x73   : > { %s2294_s24 = smov 4   ;;  %s2295_s23 = smov 64  }
  0x74   : > { %1150 = dma.hbm_to_vmem [thread:$0]  (!%p1859_p6), %s1853_s0, 128, %s1848_s25, %s1869_s18, %s2295_s23, %s2295_s23, %s2294_s24  }
  0x75   : > { %s361_s13 = scalar_lea.vmem [#allocation8], %s1839_s3  ;;  %s1628_s20 = smov [#allocation11]  }
  0x76   : > { %s1901_s22 = sshll.u32 %s361_s13, 4  ;;  %s286_s16 = sshll.u32 %s1628_s20, 4  ;;  %s287_s16 = int_to_ptr.vmem [resolvable:$true] %s286_s16  ;;  %s1972_s22 = int_to_ptr.vmem [resolvable:$true] %s1901_s22 }
  0x77   : > { %s1629_s14 = smov [#allocation12]   ;;  %s2296_s4 = sld [smem:[#allocation42_spill]] }
  0x78   : > { %s300_s17 = sshll.u32 %s1629_s14, 4  ;;  %s301_s17 = int_to_ptr.vmem [resolvable:$true] %s300_s17 }
  0x7d   : > { %s1340_s1 = scalar_lea.hbm %s2296_s4, 256 }
  0x7e   : > { %p1341_p12 = scmp.ne.s32.totalorder %s2296_s4, %s1340_s1  ;;  %p1347_p2 = scmp.lt.u32.totalorder %s1340_s1, %s2296_s4 }
  0x80   : > { %p1343_p5 = pnand %p1341_p12, %p1787_p0 }
  0x82   : > { %p1344_p10 = pneg %p1343_p5 }
  0x84   : > { %p1349_p9 = pnand %p1347_p2, %p1344_p10 }
  0x86   : > { %1352 = shalt.err (!%p1349_p9)
}
  0x87   : > { %s1353_s25 = scalar_lea.vmem %s287_s16, 256  ;;  %p1361_p13 = scmp.lt.s32.totalorder %s287_s16, %s287_s16 }
  0x88   : > { %p1354_p8 = scmp.ne.s32.totalorder %s287_s16, %s1353_s25  ;;  %p1362_p4 = scmp.lt.s32.totalorder %s1353_s25, %s1353_s25 }
  0x8a   : > { %p1356_p11 = pnand %p1354_p8, %p1787_p0  ;;  %p1363_p1 = por %p1362_p4, %p1361_p13 }
  0x8c   : > { %p1357_p7 = pneg %p1356_p11 }
  0x8e   : > { %p1364_p3 = pnand %p1363_p1, %p1357_p7 }
  0x90   : > { %1367 = shalt.err (!%p1364_p3)
}
  0x91   : > { %p2297_p12 = scmp.ne.s32.totalorder %s2282_s21, 0  ;;  %s2298_s5 = sld [smem:[#allocation43_spill]] }
  0x93   : > { %1140 = dma.hbm_to_vmem [thread:$0]  (!%p2297_p12), %s2296_s4, 256, %s287_s16, [#allocation10], %s2295_s23, %s2295_s23, %s2294_s24  }
  0x97   : > { %s1368_s20 = scalar_lea.hbm %s2298_s5, 16 }
  0x98   : > { %p1369_p5 = scmp.ne.s32.totalorder %s2298_s5, %s1368_s20  ;;  %p1375_p2 = scmp.lt.u32.totalorder %s1368_s20, %s2298_s5 }
  0x9a   : > { %p1371_p3 = pnand %p1369_p5, %p1787_p0 }
  0x9c   : > { %p1372_p10 = pneg %p1371_p3 }
  0x9e   : > { %p1377_p9 = pnand %p1375_p2, %p1372_p10 }
  0xa0   : > { %1380 = shalt.err (!%p1377_p9)
}
  0xa1   : > { %s1381_s3 = scalar_lea.vmem %s301_s17, 16  ;;  %s1388_s16 = scalar_lea.vmem %s301_s17, 32 }
  0xa2   : > { %p1382_p8 = scmp.ne.s32.totalorder %s301_s17, %s1381_s3  ;;  %p1389_p13 = scmp.lt.s32.totalorder %s301_s17, %s301_s17 }
  0xa3   : > { %p1390_p4 = scmp.lt.s32.totalorder %s1388_s16, %s1381_s3 }
  0xa4   : > { %p1384_p11 = pnand %p1382_p8, %p1787_p0 }
  0xa5   : > { %p1391_p1 = por %p1390_p4, %p1389_p13 }
  0xa6   : > { %p1385_p7 = pneg %p1384_p11 }
  0xa8   : > { %p1392_p6 = pnand %p1391_p1, %p1385_p7 }
  0xaa   : > { %1395 = shalt.err (!%p1392_p6)
}
  0xab   : > { %1143 = dma.hbm_to_vmem [thread:$0]  (!%p2297_p12), %s2298_s5, 16, %s301_s17, [#allocation13]  }
  0xac   : > { %s1072_s19 = sshll.u32 %s1618_s10, 7  ;;  %s60_s1 = sadd.s32 1, %s1602_s29 }
  0xad   : > { %p67_p0 = scmp.ne.s32.totalorder %s1602_s29, %s1598_s28  ;;  %p2299_p6 = scmp.eq.s32.totalorder %s1837_s27, 0 }
  0xae   : > { %p2300_p5 = scmp.eq.s32.totalorder %s1622_s11, 0  ;;  %p2301_p10 = scmp.eq.s32.totalorder %s1737_s12, 7 }
  0xaf   : > { %s1949_s21 = scalar_select %p2299_p6, %s1602_s29, %s60_s1  }
  0xb0   : > { %p69_p3 = por %p2300_p5, %p67_p0  ;;  %p1955_p2 = por %p2301_p10, %p67_p0 }
  0xb1   : > { %s311_s13 = sand.u32 1, %s1602_s29   ;;  %s2303_s6 = sld [smem:[#allocation38_spill]] }
  0xb2   : > { %s1026_s17 = sshll.u32 %s311_s13, 3  ;;  %p2304_p12 = scmp.lt.s32.totalorder %s1622_s11, 8 }
  0xb3   : > { %s315_s0 = scalar_lea.vmem [#allocation3], %s1026_s17  ;;  %s1976_s16 = scalar_lea.sflag [#allocation4], %s311_s13 }
  0xb4   : > { %p1967_p9 = pnand %p2304_p12, %p69_p3  ;;  %s324_s3 = sshll.u32 %s315_s0, 4  ;;  %s1974_s3 = int_to_ptr.vmem [resolvable:$true] %s324_s3 }
  0xb6   : > { %p1398_p11 = pneg %p1967_p9 }
  0xb7   : > { %s1963_s30 = scalar_lea.hbm %s2303_s6, %s1072_s19  ;;  %s1401_s1 = scalar_lea.hbm %s2303_s6, 256 }
  0xb8   : > { %s1396_s25 = scalar_lea.hbm %s1963_s30, 128  ;;  %p1402_p4 = scmp.lt.u32.totalorder %s1963_s30, %s2303_s6 }
  0xb9   : > { %p1397_p8 = scmp.ne.s32.totalorder %s1963_s30, %s1396_s25  ;;  %p1403_p1 = scmp.lt.u32.totalorder %s1401_s1, %s1396_s25 }
  0xba   : > { %p1405_p6 = scmp.lt.u32.totalorder %s1396_s25, %s1963_s30 }
  0xbb   : > { %p1399_p7 = pnand %p1398_p11, %p1397_p8  ;;  %p1404_p0 = por %p1403_p1, %p1402_p4 }
  0xbd   : > { %p1400_p13 = pneg %p1399_p7  ;;  %p1406_p5 = por %p1405_p6, %p1404_p0 }
  0xbf   : > { %p1407_p3 = pnand %p1406_p5, %p1400_p13 }
  0xc1   : > { %1410 = shalt.err (!%p1407_p3)
}
  0xc2   : > { %s1411_s13 = scalar_lea.vmem %s1974_s3, 128  ;;  %s1630_s17 = smov [#allocation3]  }
  0xc3   : > { %p1412_p10 = scmp.ne.s32.totalorder %s1974_s3, %s1411_s13  ;;  %s1416_s0 = sshll.u32 %s1630_s17, 4  ;;  %s1417_s0 = int_to_ptr.vmem [resolvable:$false] %s1416_s0 }
  0xc4   : > { %s1418_s8 = scalar_lea.vmem %s1417_s0, 256  ;;  %p1419_p7 = scmp.lt.s32.totalorder %s1974_s3, %s1417_s0 }
  0xc5   : > { %p1414_p12 = pnand %p1412_p10, %p1398_p11  ;;  %p1420_p4 = scmp.lt.s32.totalorder %s1418_s8, %s1411_s13 }
  0xc7   : > { %p1415_p8 = pneg %p1414_p12  ;;  %p1421_p1 = por %p1420_p4, %p1419_p7 }
  0xc9   : > { %p1422_p0 = pnand %p1421_p1, %p1415_p8 }
  0xcb   : > { %1425 = shalt.err (!%p1422_p0)
}
  0xcc   : > { %1147 = dma.hbm_to_vmem [thread:$0]  (!%p1967_p9), %s1963_s30, 128, %s1974_s3, %s1976_s16, %s2295_s23, %s2295_s23, %s2294_s24  }
  0xcd   : > { %s1426_s25 = scalar_lea.hbm %s1867_s15, 128  ;;  %p2306_p13 = scmp.ne.s32.totalorder %s2292_s7, 0 }
  0xce   : > { %p1427_p11 = scmp.ne.s32.totalorder %s1867_s15, %s1426_s25  ;;  %s1431_s1 = scalar_lea.hbm %s2293_s2, 1024 }
  0xcf   : > { %p2307_p6 = pneg %p2306_p13  ;;  %p1432_p10 = scmp.lt.u32.totalorder %s1867_s15, %s2293_s2 }
  0xd0   : > { %p1433_p12 = scmp.lt.u32.totalorder %s1431_s1, %s1426_s25  ;;  %p1435_p7 = scmp.lt.u32.totalorder %s1426_s25, %s1867_s15 }
  0xd1   : > { %p1429_p5 = pnand %p1427_p11, %p2307_p6 }
  0xd2   : > { %p1434_p8 = por %p1433_p12, %p1432_p10 }
  0xd3   : > { %p1430_p3 = pneg %p1429_p5 }
  0xd4   : > { %p1436_p4 = por %p1435_p7, %p1434_p8 }
  0xd6   : > { %p1437_p1 = pnand %p1436_p4, %p1430_p3 }
  0xd8   : > { %1440 = shalt.err (!%p1437_p1)
}
  0xd9   : > { %s1441_s30 = scalar_lea.vmem %s1972_s22, 128  ;;  %p2308_p0 = pmov %p2307_p6 }
  0xda   : > { %p1442_p9 = scmp.ne.s32.totalorder %s1972_s22, %s1441_s30  ;;  %s1631_s3 = smov [#allocation8]  }
  0xdb   : > { %s1446_s16 = sshll.u32 %s1631_s3, 4  ;;  %s1447_s16 = int_to_ptr.vmem [resolvable:$false] %s1446_s16 }
  0xdc   : > { %p1444_p11 = pnand %p1442_p9, %p2308_p0  ;;  %s1448_s13 = scalar_lea.vmem %s1447_s16, 256 }
  0xdd   : > { %p1449_p5 = scmp.lt.s32.totalorder %s1972_s22, %s1447_s16  ;;  %p1450_p10 = scmp.lt.s32.totalorder %s1448_s13, %s1441_s30 }
  0xde   : > { %p1445_p6 = pneg %p1444_p11 }
  0xdf   : > { %p1451_p12 = por %p1450_p10, %p1449_p5 }
  0xe1   : > { %p1452_p8 = pnand %p1451_p12, %p1445_p6 }
  0xe3   : > { %1455 = shalt.err (!%p1452_p8)
}
  0xe4   : > { %1153 = dma.hbm_to_vmem [thread:$0]  (!%p2306_p13), %s1867_s15, 128, %s1972_s22, %s1869_s18, %s2295_s23, %s2295_s23, %s2294_s24  }
  0xe5   : > { %s2309_s17 = sld [smem:[#allocation33_spill]] }
  0xeb   : > { %p2310_p3 = scmp.ne.s32.totalorder %s2309_s17, 0 }
  0xec   : > { %s2311_s0 = sld [smem:[#allocation29_spill]] (!%p2310_p3)  ;;  %s2037_s8 = sand.u32 (!%p2310_p3), 1, %s1598_s28  }
  0xed   : > { %382 = sbr.rel (%p2310_p3) target bundleno = 1387 (0x56b), region = 44  ;;  %s1038_s25 = sshll.u32 (!%p2310_p3), %s2037_s8, 3 }
  0xee   : > { %s385_s19 = scalar_lea.sflag (!%p2310_p3), [#allocation4], %s2037_s8  ;;  %s2041_s27 = scalar_lea.vmem (!%p2310_p3), [#allocation3], %s1038_s25 }
  0xf2   : > { %p2312_p7 = scmp.ne.s32.totalorder (!%p2310_p3), %s2311_s0, 0 }
  0xf4   : > { %1557 = dma.done.wait (%p2312_p7), %s385_s19, 128  }
  0xf5   : > { %1559 = vsyncadd (%p2312_p7), %s385_s19, 4294967168  ;;  %s2313_s7 = sld [smem:[#allocation24_spill]]  ;;  %s2314_s15 = sld [smem:[#allocation30_spill]] }
  0xf6   : > { %s393_s18 = sand.u32 1, %s1737_s12  }
  0xf7   : > { %s394_s22 = scalar_lea.sflag [#allocation7], %s393_s18 }
  0xfb   : > { %s2256_s24 = sand.u32 1, %s2313_s7   ;;  %p2315_p13 = scmp.ne.s32.totalorder %s2314_s15, 0 }
  0xfc   : > { %s2051_s23 = sshll.u32 %s2256_s24, 3 }
  0xfd   : > { %s397_s1 = scalar_lea.vmem [#allocation6], %s2051_s23 }
  0xfe   : > { %1561 = dma.done.wait (%p2315_p13), %s394_s22, 256  }
  0xff   : > { %1563 = vsyncadd (%p2315_p13), %s394_s22, 4294967040  ;;  %s406_s20 = scalar_lea.vmem [#allocation8], %s2051_s23  ;;  %p2316_p4 = scmp.eq.s32.totalorder %s1737_s12, 0 }
 0x101   : > { %1565 = dma.done.wait (%p2316_p4), [#allocation10], 1280   ;;  %p2317_p1 = pmov %p2316_p4 }
 0x103   : > { %1567 = vsyncadd (%p2317_p1), [#allocation10], 4294966016  ;;  %p2318_p9 = pmov %p2317_p1 }
 0x104   : > { %p2319_p0 = pmov %p2317_p1 }
 0x105   : > { %1569 = dma.done.wait (%p2318_p9), [#allocation13], 16  }
 0x106   : > { %1571 = vsyncadd (%p2319_p0), [#allocation13], 4294967280  ;;  %s1044_s14 = sshll.u32 %s2037_s8, 4  ;;  %s2071_s3 = scalar_lea.vmem [#allocation15], %s2051_s23 }
 0x107   : > { %s2068_s30 = scalar_lea.vmem [#allocation14], %s1044_s14  ;;  %s2320_s16 = sld [smem:[#allocation26_spill]] }
 0x10d   : > { %p1046_p11 = scmp.ne.s32.totalorder %s2320_s16, 0 }
 0x10e   : > { %vm472_vm0 = vcmask (!%p1046_p11), 261120   ;;  %v1632_v0 = vmov (!%p1046_p11), 0.0  }
 0x10f   : > { %471 = sbr.rel (%p1046_p11) target bundleno = 278 (0x116), region = 72  ;;  %473 = vst.msk [vmem:[#allocation2] sm:$0xff] (!%p1046_p11), %vm472_vm0, %v1632_v0  ;;  %474 = vst.msk [vmem:[#allocation2 + $0x8] sm:$0xff] (!%p1046_p11), %vm472_vm0, %v1632_v0 }
 0x116 PF: > { %s2321_s13 = sld [smem:[#allocation26_spill]]  ;;  %v1633_v1 = vmov 0.0   ;;  %vm1634_vm1 = vmmov 0   ;;  %vm559_vm2 = vcmask 64512   ;;  %v1272_v4 = vld [vmem:[%s397_s1] sm:$0xff]   ;;  %v1271_v6 = vld [vmem:[%s2041_s27] sm:$0xff]  }
 0x117   : > { %1086 = vmatprep.subr.bf16.mxu0 %v1633_v1  ;;  %1090 = vmatprep.mubr.msk.bf16.mxu0 %vm1634_vm1, %v1633_v1  ;;  %v564_v5 = vsel %vm559_vm2, %v1272_v4, 0  ;;  %vm508_vm3 = vcmask 261120   ;;  %vm607_vm4 = vcmask 130048   ;;  %v1273_v18 = vld [vmem:[%s406_s20] sm:$0xff]   ;;  %vm700_vm5 = vcmask 1043456   ;;  %v694_v47 = vld [vmem:[#allocation2] sm:$0xff] }
 0x118   : > { %1094 = vmatprep.subr.bf16.mxu1 %v1633_v1  ;;  %1096 = vmatprep.mubr.msk.bf16.mxu1 %vm1634_vm1, %v1633_v1  ;;  %vm638_vm6 = vcmask 125952   ;;  %v695_v49 = vld [vmem:[#allocation2 + $0x8] sm:$0xff] }
 0x119   : > { %1095 = vmatpush3.bf16.xpose.msra.mxu1 %v564_v5 }
 0x11a   : > { %1106 = vmatprep.subr.bf16.mxu1 %v1633_v1 }
 0x11c   : > { %s1073_s17 = sshll.u32 %s2321_s13, 4  ;;  %s1049_s0 = sshll.u32 %s2321_s13, 2 }
 0x11d   : > { %s483_s12 = scalar_lea.vmem [#allocation9], %s1073_s17  ;;  %s489_s25 = scalar_lea.vmem [#allocation11], %s1049_s0 }
 0x11e   : > { %v1269_v2 = vld [vmem:[%s483_s12] sm:$0xff]   ;;  %v1270_v3 = vld [vmem:[%s483_s12 + $0x8] sm:$0xff]   ;;  %p1061_p6 = scmp.ne.s32.totalorder %s2321_s13, 3 }
 0x11f   : > { %1087 = vmatpush3.bf16.msra.mxu0 %v1269_v2  ;;  %v490_v30 = vld [vmem:[%s489_s25] sm:$0xf]  ;;  %v1062_v56 = vld [vmem:[#allocation12] ss:$0 sm:$0xff] (!%p1061_p6) }
 0x120   : > { %1088 = vmatprep.subr.bf16.mxu0 %v1633_v1  ;;  %v702_v31 = vsel %vm700_vm5, %v490_v30, 0 }
 0x123   : > { %1089 = vmatpush3.bf16.msra.mxu0 %v1270_v3 }
 0x124   : > { %1100 = vmatprep.subr.bf16.mxu0 %v1633_v1 }
 0x126   : > { %1091 = vmatmul.mubr.msk.bf16.vlgmr.msra.gmra.mrb[0].mxu0 %vm508_vm3, %v1271_v6 }
 0x127   : > { %1102 = vmatprep.mubr.msk.bf16.mxu0 %vm1634_vm1, %v1633_v1  ;;  %1101 = vmatpush3.bf16.msra.mxu0 %v1273_v18 }
 0x1f9   : > { %v546_v7 = vpop.f32.mrb[0].mxu0 }
 0x1fa   : > { %v1092_v8 = vpop.f32.mrb[1].mxu0 }
 0x1fb   : > { %v549_v9 = vpop.f32.mrb[2].mxu0 }
 0x1fc   : > { %v553_v10 = vpack.c.bf16 %v549_v9, %v546_v7  ;;  %v1093_v11 = vpop.f32.mrb[3].mxu0 }
 0x1fe   : > { %1097 = vmatmul.mubr.msk.bf16.vlgmr.msra.gmra.mrb[0].mxu1 %vm559_vm2, %v553_v10 }
 0x1ff   : > { %1108 = vmatprep.mubr.msk.bf16.mxu1 %vm1634_vm1, %v1633_v1  ;;  %1107 = vmatpush3.bf16.msra.mxu1 %v702_v31 }
 0x2d1   : > { %v600_v12 = vpop.f32.mrb[0].mxu1 }
 0x2d2   : > { %v1098_v13 = vpop.f32.mrb[1].mxu1  ;;  %v608_v14 = vsel %vm607_vm4, %v600_v12, -inf }
 0x2d3   : > { %609 = vmax.xlane.f32.xlu0 %v608_v14  ;;  %v603_v15 = vpop.f32.mrb[2].mxu1 }
 0x2d4   : > { %v1099_v16 = vpop.f32.mrb[3].mxu1  ;;  %v611_v17 = vsel %vm607_vm4, %v603_v15, -inf }
 0x2d7   : > { %612 = vmax.xlane.f32.xlu0 %v611_v17 }
 0x360   : > { %v610_v19 = vpop.xlane.xlu0 %609 }
 0x361   : > { %v614_v20 = vsub.f32 %v600_v12, %v610_v19 }
 0x363   : > { %v616_v21 = vmul.f32 1.442695, %v614_v20 }
 0x364   : > { %v613_v22 = vpop.xlane.xlu0 %612 }
 0x365   : > { %1274 = vpow2.f32 %v616_v21  ;;  %v615_v23 = vsub.f32 %v603_v15, %v613_v22 }
 0x367   : > { %v618_v24 = vmul.f32 1.442695, %v615_v23 }
 0x369   : > { %1276 = vpow2.f32 %v618_v24 }
 0x36f   : > { %v1275_v25 = vpop.eup %1274 }
 0x370   : > { %v620_v26 = vsel %vm607_vm4, %v1275_v25, 0.0 }
 0x371   : > { %621 = vadd.xlane.f32.xlu1 %v620_v26 }
 0x373   : > { %v1277_v27 = vpop.eup %1276 }
 0x374   : > { %v623_v28 = vsel %vm607_vm4, %v1277_v27, 0.0  ;;  %v641_v29 = vpack.c.bf16 %v1277_v27, %v1275_v25 }
 0x375   : > { %624 = vadd.xlane.f32.xlu1 %v623_v28 }
 0x376   : > { %1103 = vmatmul.mubr.msk.bf16.vlgmr.msra.gmra.mrb[4].mxu0 %vm607_vm4, %v641_v29 }
 0x3fe   : > { %v622_v32 = vpop.xlane.xlu1 %621 }
 0x3ff   : > { %1278 = vrcp.f32 %v622_v32 }
 0x402   : > { %v625_v33 = vpop.xlane.xlu1 %624 }
 0x403   : > { %1280 = vrcp.f32 %v625_v33 }
 0x409   : > { %v1279_v34 = vpop.eup %1278 }
 0x40a   : > { %v628_v35 = vmul.f32 %v1279_v34, %v1275_v25 }
 0x40c   : > { %v1074_v36 = vpack.c.bf16 %v628_v35, %v628_v35 }
 0x40d   : > { %v1281_v37 = vpop.eup %1280 }
 0x40e   : > { %639 = vst.msk [vmem:[%s2071_s3] sm:$0xf] %vm638_vm6, %v1074_v36  ;;  %v629_v38 = vmul.f32 %v1281_v37, %v1277_v27 }
 0x410   : > { %v1075_v39 = vpack.c.bf16 %v629_v38, %v629_v38 }
 0x412   : > { %640 = vst.msk [vmem:[%s2071_s3 + $0x4] sm:$0xf] %vm638_vm6, %v1075_v39 }
 0x449   : > { %v685_v40 = vpop.f32.mrb[4].mxu0 }
 0x44a   : > { %v692_v41 = vmul.f32 %v1279_v34, %v685_v40  ;;  %v1104_v42 = vpop.f32.mrb[5].mxu0 }
 0x44b   : > { %v688_v43 = vpop.f32.mrb[6].mxu0 }
 0x44c   : > { %v693_v44 = vmul.f32 %v1281_v37, %v688_v43  ;;  %v1105_v45 = vpop.f32.mrb[7].mxu0 }
 0x44e   : > { %v696_v46 = vpack.c.bf16 %v693_v44, %v692_v41 }
 0x450   : > { %1109 = vmatmul.mubr.msk.bf16.vlgmr.msra.gmra.mrb[4].mxu1 %vm559_vm2, %v696_v46 }
 0x522   : > { %752 = sbr.rel (%p1061_p6) target bundleno = 1331 (0x533), region = 76 }
 0x523   : > { %v738_v48 = vpop.f32.mrb[4].mxu1 }
 0x524   : > { %v745_v50 = vadd.f32 %v738_v48, %v694_v47  ;;  %v1110_v51 = vpop.f32.mrb[5].mxu1 }
 0x525   : > { %v741_v52 = vpop.f32.mrb[6].mxu1 }
 0x526   : > { %747 = vst.msk [vmem:[#allocation2] sm:$0xff] %vm508_vm3, %v745_v50  ;;  %v746_v53 = vadd.f32 %v741_v52, %v695_v49  ;;  %v1111_v54 = vpop.f32.mrb[7].mxu1 }
 0x528   : > { %748 = vst.msk [vmem:[#allocation2 + $0x8] sm:$0xff] %vm508_vm3, %v746_v53 }
 0x52d   : > { %v753_v55 = vld [vmem:[#allocation2] sm:$0xff] }
 0x52e   : > { %v762_v58 = vadd.f32 %v1062_v56, %v753_v55 }
 0x52f   : > { %v754_v57 = vld [vmem:[#allocation2 + $0x8] sm:$0xff] }
 0x530   : > { %v763_v59 = vadd.f32 %v1062_v56, %v754_v57  ;;  %764 = vst.msk [vmem:[%s2068_s30] sm:$0xff] %vm508_vm3, %v762_v58 }
 0x532   : > { %765 = vst.msk [vmem:[%s2068_s30 + $0x8] sm:$0xff] %vm508_vm3, %v763_v59 }
 0x533 PF: > { %s2322_s19 = sld [smem:[#allocation27_spill]]  ;;  %s2323_s18 = sld [smem:[#allocation44_spill]] }
 0x534   : > { %s787_s22 = sshll.u32 %s2068_s30, 4  ;;  %s767_s1 = scalar_lea.sflag [#allocation5], %s2037_s8  ;;  %s2108_s22 = int_to_ptr.vmem [resolvable:$true] %s787_s22 }
 0x535   : > { %s1456_s20 = scalar_lea.vmem %s2108_s22, 256  ;;  %s1635_s14 = smov [#allocation14]  }
 0x536   : > { %p1457_p5 = scmp.ne.s32.totalorder %s2108_s22, %s1456_s20  ;;  %s1460_s16 = sshll.u32 %s1635_s14, 4  ;;  %s1461_s16 = int_to_ptr.vmem [resolvable:$false] %s1460_s16 }
 0x537   : > { %s1462_s13 = scalar_lea.vmem %s1461_s16, 512  ;;  %p1463_p8 = scmp.lt.s32.totalorder %s2108_s22, %s1461_s16 }
 0x538   : > { %p1458_p10 = pnand %p1457_p5, %p1955_p2  ;;  %p1464_p3 = scmp.lt.s32.totalorder %s1462_s13, %s1456_s20 }
 0x539   : > { %s1076_s27 = sshll.u32 %s2322_s19, 8 }
 0x53a   : > { %s2105_s23 = scalar_lea.hbm %s2323_s18, %s1076_s27  ;;  %p1459_p12 = pneg %p1458_p10 }
 0x53b   : > { %p1465_p7 = por %p1464_p3, %p1463_p8 }
 0x53d   : > { %p1466_p13 = pnand %p1465_p7, %p1459_p12 }
 0x53f   : > { %1469 = shalt.err (!%p1466_p13)
}
 0x540   : > { %s1470_s30 = scalar_lea.hbm %s2105_s23, 256  ;;  %s1474_s0 = scalar_lea.hbm %s2323_s18, 512 }
 0x541   : > { %p1471_p4 = scmp.ne.s32.totalorder %s2105_s23, %s1470_s30  ;;  %p1475_p0 = scmp.lt.u32.totalorder %s2105_s23, %s2323_s18 }
 0x542   : > { %p1476_p11 = scmp.lt.u32.totalorder %s1474_s0, %s1470_s30  ;;  %p1478_p5 = scmp.lt.u32.totalorder %s1470_s30, %s2105_s23 }
 0x543   : > { %p1472_p1 = pnand %p1471_p4, %p1955_p2 }
 0x544   : > { %p1477_p6 = por %p1476_p11, %p1475_p0 }
 0x545   : > { %p1473_p9 = pneg %p1472_p1 }
 0x546   : > { %p1479_p10 = por %p1478_p5, %p1477_p6 }
 0x548   : > { %p1480_p12 = pnand %p1479_p10, %p1473_p9 }
 0x54a   : > { %1483 = shalt.err (!%p1480_p12)
}
 0x54b   : > { %s1636_s7 = smov 128   ;;  %s2324_s15 = sld [smem:[#allocation26_spill]] }
 0x54c   : > { %s2325_s20 = sld [smem:[#allocation24_spill]]  ;;  %s2326_s14 = sld [smem:[#allocation35_spill]] }
 0x54d   : > { %s1637_s16 = smov 8   ;;  %s1068_s17 = sshll.u32 %s2322_s19, 3 }
 0x54e   : > { %1130 = dma.vmem_to_hbm [thread:$0]  (%p1955_p2), %s2108_s22, 256, %s2105_s23, %s767_s1, %s1636_s7, %s1636_s7, %s1637_s16  }
 0x54f   : > { %s807_s12 = sshll.u32 %s2071_s3, 4  ;;  %s2327_s24 = sld [smem:[#allocation45_spill]]  ;;  %s2137_s12 = int_to_ptr.vmem [resolvable:$true] %s807_s12 }
 0x550   : > { %s1484_s9 = scalar_lea.vmem %s2137_s12, 128  ;;  %s1638_s8 = smov [#allocation15]  }
 0x551   : > { %s1067_s13 = sshll.u32 %s2324_s15, 1  ;;  %p1485_p2 = scmp.ne.s32.totalorder %s2137_s12, %s1484_s9 }
 0x552   : > { %s804_s30 = sadd.s32 %s1068_s17, %s1067_s13  ;;  %s2329_s5 = sand.u32 1, %s2325_s20  }
 0x553   : > { %s1069_s0 = sshll.u32 %s804_s30, 6  ;;  %s2146_s6 = scalar_lea.sflag [#allocation16], %s2329_s5 }
 0x554   : > { %p2330_p8 = scmp.ne.s32.totalorder %s2326_s14, 0  ;;  %s1488_s3 = sshll.u32 %s1638_s8, 4  ;;  %s1489_s3 = int_to_ptr.vmem [resolvable:$false] %s1488_s3 }
 0x555   : > { %s2328_s2 = smov %s2327_s24  ;;  %s2142_s4 = scalar_lea.hbm %s2327_s24, %s1069_s0 }
 0x556   : > { %p1486_p3 = pnand %p1485_p2, %p2330_p8  ;;  %s1490_s19 = scalar_lea.vmem %s1489_s3, 256 }
 0x557   : > { %p1491_p13 = scmp.lt.s32.totalorder %s2137_s12, %s1489_s3  ;;  %p1492_p4 = scmp.lt.s32.totalorder %s1490_s19, %s1484_s9 }
 0x558   : > { %p1487_p7 = pneg %p1486_p3 }
 0x559   : > { %p1493_p1 = por %p1492_p4, %p1491_p13 }
 0x55b   : > { %p1494_p9 = pnand %p1493_p1, %p1487_p7 }
 0x55d   : > { %1497 = shalt.err (!%p1494_p9)
}
 0x55e   : > { %s1498_s5 = scalar_lea.hbm %s2142_s4, 128  ;;  %s1502_s22 = scalar_lea.hbm %s2328_s2, 1024 }
 0x55f   : > { %p1499_p0 = scmp.ne.s32.totalorder %s2142_s4, %s1498_s5  ;;  %p1503_p5 = scmp.lt.u32.totalorder %s2142_s4, %s2328_s2 }
 0x560   : > { %p1504_p10 = scmp.lt.u32.totalorder %s1502_s22, %s1498_s5  ;;  %p1506_p2 = scmp.lt.u32.totalorder %s1498_s5, %s2142_s4 }
 0x561   : > { %p1500_p11 = pnand %p1499_p0, %p2330_p8 }
 0x562   : > { %p1505_p12 = por %p1504_p10, %p1503_p5 }
 0x563   : > { %p1501_p6 = pneg %p1500_p11 }
 0x564   : > { %p1507_p3 = por %p1506_p2, %p1505_p12 }
 0x566   : > { %p1508_p7 = pnand %p1507_p3, %p1501_p6 }
 0x568   : > { %1511 = shalt.err (!%p1508_p7)
}
 0x569   : > { %s1639_s15 = smov 64   ;;  %s1640_s20 = smov 4  }
 0x56a   : > { %1131 = dma.vmem_to_hbm [thread:$0]  (%p2330_p8), %s2137_s12, 128, %s2142_s4, %s2146_s6, %s1639_s15, %s1639_s15, %s1640_s20  }
 0x56b PF: > { %s2331_s16 = sld [smem:[#allocation25_spill]]  ;;  %s2332_s13 = sld [smem:[#allocation31_spill]] }
 0x56c   : > { %p1168_p13 = scmp.ge.s32.totalorder %s1622_s11, 2 }
 0x571   : > { %s822_s17 = sand.u32 1, %s2331_s16   ;;  %p2333_p4 = scmp.ne.s32.totalorder %s2332_s13, 0 }
 0x572   : > { %s823_s30 = scalar_lea.sflag [#allocation5], %s822_s17 }
 0x573   : > { %p1155_p1 = pnand %p1168_p13, %p2333_p4 }
 0x575   : > { %1573 = dma.done.wait (!%p1155_p1), %s823_s30, 256  }
 0x576   : > { %1575 = vsyncadd (!%p1155_p1), %s823_s30, 4294967040  ;;  %s2334_s0 = sld [smem:[#allocation23_spill]]  ;;  %s2335_s25 = sld [smem:[#allocation32_spill]] }
 0x57c   : > { %s831_s27 = sand.u32 1, %s2334_s0   ;;  %p2336_p9 = scmp.ne.s32.totalorder %s2335_s25, 0 }
 0x57d   : > { %s832_s9 = scalar_lea.sflag [#allocation16], %s831_s27 }
 0x57e   : > { %p1158_p0 = pnand %p1168_p13, %p2336_p9 }
 0x580   : > { %1577 = dma.done.wait (!%p1158_p0), %s832_s9, 128  }
 0x581   : > { %1579 = vsyncadd (!%p1158_p0), %s832_s9, 4294967168  ;;  %s32_s11 = sadd.s32 1, %s1622_s11   ;;  %s2337_s24 = sld [smem:[#allocation24_spill]] }
 0x582   : > { %p29_p8 = scmp.ge.s32.totalorder %s32_s11, 10   ;;  %s2338_s4 = sld [smem:[#allocation37_spill]] }
 0x583   : > { %s2339_s30 = sld [smem:[#allocation28_spill]]  ;;  %s2340_s9 = sld [smem:[#allocation34_spill]] }
 0x584   : > { %s2341_s6 = sld [smem:[#allocation36_spill]]  ;;  %s2342_s25 = smov %s1590_s26 }
 0x585   : > { %s2344_s27 = smov %s1598_s28  ;;  %s2345_s28 = smov %s1602_s29 }
 0x586   : > { %s2346_s29 = smov %s1949_s21  ;;  %s2347_s8 = smov %s1618_s10 }
 0x587   :  { %31 = sbr.rel (!%p29_p8) target bundleno = 24 (0x18), region = 152 }
 0x588   : > { %s2343_s26 = smov %s2338_s4 }
 0x58a   : > { %s2348_s10 = smov %s2341_s6 }
 0x58e   :  { %837 = vsyncpa [#allocation4], 1 }
 0x58f   :  { %839 = vsyncpa [#allocation4 + $0x1], 1 }
 0x590   :  { %840 = vsyncpa [#allocation7], 1 }
 0x591   :  { %842 = vsyncpa [#allocation7 + $0x1], 1 }
 0x592   :  { %843 = vsyncpa [#allocation10], 1 }
 0x593   :  { %844 = vsyncpa [#allocation13], 1 }
 0x594   :  { %845 = vsyncpa [#allocation5], 1 }
 0x595   :  { %847 = vsyncpa [#allocation5 + $0x1], 1 }
 0x596   :  { %848 = vsyncpa [#allocation16], 1 }
 0x597   :  { %850 = vsyncpa [#allocation16 + $0x1], 1 }

</bundles_post_ra>
